<compile_context>
chip_gen: v6e
topology: v6e:2x2x1
jax: 0.10.0
libtpu: 0.0.40
codegen_flags: <defaults>
</compile_context>

<pallas_src>
import jax
import jax.numpy as jnp
from jax.experimental import pallas as pl
from jax.experimental.pallas import tpu as pltpu


def anfis_kernel(x_ref, wt_ref, m_ref, o_ref):
    # x: (TB, n_inputs), wt: (n_inputs, n_rules), m: (1, n_rules), o: (1, TB)
    x = x_ref[...].astype(jnp.float32)
    wt = wt_ref[...].astype(jnp.float32)
    m = m_ref[...].astype(jnp.float32)

    # reglas = x @ pesos.T  (pesos pre-transposed) -> (TB, n_rules) on the MXU.
    reglas = jnp.dot(x, wt, preferred_element_type=jnp.float32)

    # Numerically stable softmax fused with the (n_rules -> 1) projection:
    #   probs @ membresia == sum(e * m) / sum(e)
    r_max = jnp.max(reglas, axis=-1, keepdims=True)          # (TB, 1)
    e = jnp.exp(reglas - r_max)                              # (TB, n_rules)  VPU/EUP
    denom = jnp.sum(e, axis=-1)                              # (TB,)          XLU lane reduce
    numer = jnp.sum(e * m, axis=-1)                          # (TB,)          fused weighted sum
    out = numer * pl.reciprocal(denom, approx=True)          # (TB,)          EUP vrcp

    # TODO(synk): nn.Dropout(p=0.2) is identity in eval mode; training-mode stochastic
    # masking (pltpu.prng_seed + prng_random_bits) is not reproduced here.

    # Lane-dense store: batch rows of this tile live on lanes -> unmasked vst.
    o_ref[...] = out[None, :].astype(o_ref.dtype)


def anfis_forward(x, pesos, membresia, *, block_b=128):
    B, n_inputs = x.shape
    n_rules = pesos.shape[0]

    TB = block_b
    num_tiles = pl.cdiv(B, TB)
    B_pad = num_tiles * TB
    if B_pad != B:
        x = jnp.pad(x, ((0, B_pad - B), (0, 0)))

    # One-time layout plumbing in XLA (outside the kernel):
    wt = pesos.T                                   # (n_inputs, n_rules)
    m_row = membresia.reshape(1, n_rules)          # lane-major membresia

    out_tiles = pl.pallas_call(
        anfis_kernel,
        out_shape=jax.ShapeDtypeStruct((num_tiles, TB), x.dtype),
        grid=(num_tiles,),
        in_specs=[
            pl.BlockSpec((TB, n_inputs), lambda i: (i, 0)),        # x tile
            pl.BlockSpec((n_inputs, n_rules), lambda i: (0, 0)),   # weights (broadcast)
            pl.BlockSpec((1, n_rules), lambda i: (0, 0)),          # membresia row (broadcast)
        ],
        out_specs=pl.BlockSpec((1, TB), lambda i: (i, 0)),
        compiler_params=pltpu.CompilerParams(
            dimension_semantics=("parallel",),                     # v7x: shard batch tiles over 2 TCs
        ),
    )(x, wt, m_row)

    # (num_tiles, TB) row-major == batch order; back to the module's (B, 1) shape.
    return out_tiles.reshape(B_pad, 1)[:B]


def init_params(key, n_inputs, n_rules):
    k_w, k_m = jax.random.split(key)
    # xavier_uniform_ on (n_rules, n_inputs): fan_in=n_inputs, fan_out=n_rules
    bound = jnp.sqrt(6.0 / (n_inputs + n_rules))
    pesos = jax.random.uniform(k_w, (n_rules, n_inputs), jnp.float32,
                               minval=-bound, maxval=bound)
    membresia = jax.random.normal(k_m, (n_rules, 1), jnp.float32) * 0.1
    return pesos, membresia


def anfis_reference(x, pesos, membresia):
    reglas = x @ pesos.T
    reglas = reglas - jnp.max(reglas, axis=1, keepdims=True)
    e = jnp.exp(reglas)
    probs = e / jnp.sum(e, axis=1, keepdims=True)
    return probs @ membresia


if __name__ == "__main__":
    key = jax.random.PRNGKey(0)
    k_x, k_p = jax.random.split(key)

    batch = 8
    n_inputs = 32
    n_rules = 200  # matches `reglas = 200` in the original script

    x = jax.random.normal(k_x, (batch, n_inputs), jnp.float32)
    pesos, membresia = init_params(k_p, n_inputs, n_rules)

    out = anfis_forward(x, pesos, membresia)
    out = jax.block_until_ready(out)

    ref = anfis_reference(x, pesos, membresia)
    assert out.shape == (batch, 1)
    # Slightly relaxed tolerance for the approx (EUP) reciprocal in the softmax denominator.
    assert jnp.allclose(out, ref, atol=1e-4, rtol=1e-3), float(jnp.max(jnp.abs(out - ref)))

    print("KERNEL_OK")
</pallas_src>

<mosaic_0001>
module attributes {stable_mosaic.version = 11 : i64} {
  func.func @anfis_kernel(%arg0: i32, %arg1: memref<128x32xf32, #tpu.memory_space<vmem>>, %arg2: memref<32x200xf32, #tpu.memory_space<vmem>>, %arg3: memref<1x200xf32, #tpu.memory_space<vmem>>, %arg4: memref<1x128xf32, #tpu.memory_space<vmem>>) attributes {dimension_semantics = [#tpu.dimension_semantics<parallel>], iteration_bounds = array<i64: 1>, scalar_prefetch = 0 : i64, scratch_operands = 0 : i64, tpu.core_type = #tpu.core_type<tc>, window_params = [{transform_indices = @transform_0, window_bounds = array<i64: 128, 32>}, {pipeline_mode = #tpu.pipeline_mode<synchronous>, transform_indices = @transform_1, window_bounds = array<i64: 32, 200>}, {pipeline_mode = #tpu.pipeline_mode<synchronous>, transform_indices = @transform_2, window_bounds = array<i64: 1, 200>}, {transform_indices = @transform_3, window_bounds = array<i64: 1, 128>}]} {
    %c0 = arith.constant 0 : index
    %c0_0 = arith.constant 0 : index
    %0 = vector.load %arg1[%c0, %c0_0] : memref<128x32xf32, #tpu.memory_space<vmem>>, vector<128x32xf32>
    %c0_1 = arith.constant 0 : index
    %c0_2 = arith.constant 0 : index
    %1 = vector.load %arg2[%c0_1, %c0_2] : memref<32x200xf32, #tpu.memory_space<vmem>>, vector<32x200xf32>
    %c0_3 = arith.constant 0 : index
    %c0_4 = arith.constant 0 : index
    %2 = vector.load %arg3[%c0_3, %c0_4] : memref<1x200xf32, #tpu.memory_space<vmem>>, vector<1x200xf32>
    %cst = arith.constant dense<0.000000e+00> : vector<128x200xf32>
    %3 = tpu.matmul %0, %1, %cst {dimension_numbers = #tpu.dot_dimension_numbers<[1], [0], [0], [1], [0, 0, 1, 1], [], []>} : vector<128x32xf32>, vector<32x200xf32>, vector<128x200xf32> -> vector<128x200xf32>
    %cst_5 = arith.constant dense<0xFF800000> : vector<128xf32>
    %4 = vector.multi_reduction <maximumf>, %3, %cst_5 [1] : vector<128x200xf32> to vector<128xf32>
    %5 = vector.shape_cast %4 : vector<128xf32> to vector<128x1xf32>
    %6 = vector.broadcast %5 : vector<128x1xf32> to vector<128x200xf32>
    %7 = arith.subf %3, %6 : vector<128x200xf32>
    %8 = math.exp %7 : vector<128x200xf32>
    %cst_6 = arith.constant dense<0.000000e+00> : vector<128xf32>
    %9 = vector.multi_reduction <add>, %8, %cst_6 [1] : vector<128x200xf32> to vector<128xf32>
    %10 = vector.broadcast %2 : vector<1x200xf32> to vector<128x200xf32>
    %11 = arith.mulf %8, %10 : vector<128x200xf32>
    %cst_7 = arith.constant dense<0.000000e+00> : vector<128xf32>
    %12 = vector.multi_reduction <add>, %11, %cst_7 [1] : vector<128x200xf32> to vector<128xf32>
    %13 = tpu.reciprocal %9 {approx = true} : vector<128xf32> -> vector<128xf32>
    %14 = arith.mulf %12, %13 : vector<128xf32>
    %15 = vector.shape_cast %14 : vector<128xf32> to vector<1x128xf32>
    %c0_8 = arith.constant 0 : index
    %c0_9 = arith.constant 0 : index
    %16 = vector.load %arg4[%c0_8, %c0_9] : memref<1x128xf32, #tpu.memory_space<vmem>>, vector<1x128xf32>
    tpu.vector_store %arg4[%c0_8, %c0_9], %15 {strides = array<i32>} : memref<1x128xf32, #tpu.memory_space<vmem>>, vector<1x128xf32>,
    return
  }
  func.func @transform_0(%arg0: i32) -> (i32, i32) {
    %c0_i32 = arith.constant 0 : i32
    %c0_i32_0 = arith.constant 0 : i32
    return %arg0, %c0_i32 : i32, i32
  }
  func.func @transform_1(%arg0: i32) -> (i32, i32) {
    %c0_i32 = arith.constant 0 : i32
    %c0_i32_0 = arith.constant 0 : i32
    %c0_i32_1 = arith.constant 0 : i32
    return %c0_i32, %c0_i32_0 : i32, i32
  }
  func.func @transform_2(%arg0: i32) -> (i32, i32) {
    %c0_i32 = arith.constant 0 : i32
    %c0_i32_0 = arith.constant 0 : i32
    %c0_i32_1 = arith.constant 0 : i32
    return %c0_i32, %c0_i32_0 : i32, i32
  }
  func.func @transform_3(%arg0: i32) -> (i32, i32) {
    %c0_i32 = arith.constant 0 : i32
    %c0_i32_0 = arith.constant 0 : i32
    return %arg0, %c0_i32 : i32, i32
  }
}

</mosaic_0001>

<bundles_post_ra>
// kernel: tpu_custom_call.1
= control target key start
LH: loop header
LB: loop body
LE: loop exit
PB: predicated region body
PF: predicated region fallthrough
CT: control target
= control target key end

     0   :  { %vm40_vm0 = vcmask 261120   ;;  %s1354_s0 = inlined_call_operand.vmem [shape: f32[128,32], index: 0, kind: input, shape index: {}]   ;;  %s1355_s1 = inlined_call_operand.vmem [shape: f32[32,200], index: 1, kind: input, shape index: {}]   ;;  %s1356_s2 = inlined_call_operand.vmem [shape: f32[1,200], index: 2, kind: input, shape index: {}]   ;;  %s1357_s3 = inlined_call_operand.hbm [shape: f32[1,128], index: 3, kind: output, shape index: {}]  }
   0x1   :  { %v38_v0 = vld [vmem:[%s1355_s1 + $0x38] sm:$0xff]  ;;  %v37_v1 = vld [vmem:[%s1355_s1 + $0x30] sm:$0xff]  ;;  %v36_v2 = vld [vmem:[%s1355_s1 + $0x28] sm:$0xff] }
   0x2   :  { %113 = vmatprep.subr.mxu0 %v38_v0  ;;  %773 = vmatprep.subr.mxu1 %v38_v0  ;;  %v35_v3 = vld [vmem:[%s1355_s1 + $0x20] sm:$0xff]  ;;  %v34_v4 = vld [vmem:[%s1355_s1 + $0x18] sm:$0xff]  ;;  %v33_v5 = vld [vmem:[%s1355_s1 + $0x10] sm:$0xff] }
   0x3   :  { %114 = vmatpush1.msra.mxu0 %v37_v1  ;;  %777 = vmatpush1.msra.mxu1 %v37_v1  ;;  %v32_v6 = vld [vmem:[%s1355_s1 + $0x8] sm:$0xff]  ;;  %v31_v7 = vld [vmem:[%s1355_s1] sm:$0xff] }
   0x4   :  { %115 = vmatprep.subr.mxu0 %v36_v2  ;;  %774 = vmatprep.subr.mxu1 %v36_v2  ;;  %v15_v8 = vld [vmem:[%s1354_s0] sm:$0xff] }
   0x5   :  { %116 = vmatpush1.msra.mxu0 %v35_v3  ;;  %778 = vmatpush1.msra.mxu1 %v35_v3  ;;  %v23_v9 = vld [vmem:[%s1354_s0 + $0x40] sm:$0xff] }
   0x6   :  { %117 = vmatprep.subr.mxu0 %v34_v4  ;;  %775 = vmatprep.subr.mxu1 %v34_v4 }
   0x7   :  { %118 = vmatpush1.msra.mxu0 %v33_v5  ;;  %779 = vmatpush1.msra.mxu1 %v33_v5 }
   0x8   :  { %119 = vmatprep.subr.mxu0 %v32_v6  ;;  %776 = vmatprep.subr.mxu1 %v32_v6 }
   0x9   :  { %120 = vmatpush1.msra.mxu0 %v31_v7  ;;  %780 = vmatpush1.msra.mxu1 %v31_v7 }
   0xa   :  { %8 = vsyncpa [#allocation3], 0  ;;  %v901_v10 = vmov 0.0   ;;  %v16_v11 = vld [vmem:[%s1354_s0 + $0x8] sm:$0xff]  ;;  %v17_v13 = vld [vmem:[%s1354_s0 + $0x10] sm:$0xff]  ;;  %vm250_vm1 = vcmask 588800  }
   0xb   :  { %153 = vmatprep.mubr.f32.mxu0 %v901_v10  ;;  %201 = vmatprep.mubr.f32.mxu1 %v901_v10  ;;  %v24_v12 = vld [vmem:[%s1354_s0 + $0x48] sm:$0xff]  ;;  %v25_v14 = vld [vmem:[%s1354_s0 + $0x50] sm:$0xff]  ;;  %v18_v15 = vld [vmem:[%s1354_s0 + $0x18] sm:$0xff]  ;;  %vm641_vm2 = vcmask 130112   ;;  %vm648_vm3 = vcmask 195712   ;;  %vm655_vm4 = vcmask 261312  }
   0xc   :  { %757 = vmatmul.mubr.msk.f32.vlgmr.msra.gmra.mxu0 %vm40_vm0, %v15_v8  ;;  %765 = vmatmul.mubr.msk.f32.vlgmr.msra.gmra.mxu1 %vm40_vm0, %v23_v9  ;;  %v26_v16 = vld [vmem:[%s1354_s0 + $0x58] sm:$0xff]  ;;  %v19_v17 = vld [vmem:[%s1354_s0 + $0x20] sm:$0xff]  ;;  %v20_v19 = vld [vmem:[%s1354_s0 + $0x28] sm:$0xff]  ;;  %vm662_vm5 = vcmask 326912   ;;  %vm669_vm6 = vcmask 392512   ;;  %vm676_vm7 = vcmask 458112  }
   0xd   :  { %159 = vmatprep.mubr.f32.mxu0 %v901_v10  ;;  %207 = vmatprep.mubr.f32.mxu1 %v901_v10  ;;  %v27_v18 = vld [vmem:[%s1354_s0 + $0x60] sm:$0xff]  ;;  %v28_v20 = vld [vmem:[%s1354_s0 + $0x68] sm:$0xff]  ;;  %v21_v21 = vld [vmem:[%s1354_s0 + $0x30] sm:$0xff]  ;;  %vm683_vm8 = vcmask 523712   ;;  %vm690_vm9 = vcmask 589312   ;;  %vm697_vm10 = vcmask 654912  }
   0xe   :  { %v29_v22 = vld [vmem:[%s1354_s0 + $0x70] sm:$0xff]  ;;  %v22_v23 = vld [vmem:[%s1354_s0 + $0x38] sm:$0xff]  ;;  %vm704_vm11 = vcmask 720512   ;;  %vm711_vm12 = vcmask 786112   ;;  %vm718_vm13 = vcmask 851712   ;;  %vm725_vm14 = vcmask 917312  }
   0xf   :  { %v30_v24 = vld [vmem:[%s1354_s0 + $0x78] sm:$0xff]  ;;  %vm732_vm15 = vcmask 982912  }
  0x10   :  { %758 = vmatmul.mubr.msk.f32.gmra.mxu0 %vm40_vm0, %v16_v11  ;;  %766 = vmatmul.mubr.msk.f32.gmra.mxu1 %vm40_vm0, %v24_v12 }
  0x11   :  { %165 = vmatprep.mubr.f32.mxu0 %v901_v10  ;;  %213 = vmatprep.mubr.f32.mxu1 %v901_v10 }
  0x14   :  { %759 = vmatmul.mubr.msk.f32.gmra.mxu0 %vm40_vm0, %v17_v13  ;;  %767 = vmatmul.mubr.msk.f32.gmra.mxu1 %vm40_vm0, %v25_v14 }
  0x15   :  { %171 = vmatprep.mubr.f32.mxu0 %v901_v10  ;;  %219 = vmatprep.mubr.f32.mxu1 %v901_v10 }
  0x18   :  { %760 = vmatmul.mubr.msk.f32.gmra.mxu0 %vm40_vm0, %v18_v15  ;;  %768 = vmatmul.mubr.msk.f32.gmra.mxu1 %vm40_vm0, %v26_v16 }
  0x19   :  { %177 = vmatprep.mubr.f32.mxu0 %v901_v10  ;;  %225 = vmatprep.mubr.f32.mxu1 %v901_v10 }
  0x1c   :  { %761 = vmatmul.mubr.msk.f32.gmra.mxu0 %vm40_vm0, %v19_v17  ;;  %769 = vmatmul.mubr.msk.f32.gmra.mxu1 %vm40_vm0, %v27_v18 }
  0x1d   :  { %183 = vmatprep.mubr.f32.mxu0 %v901_v10  ;;  %231 = vmatprep.mubr.f32.mxu1 %v901_v10 }
  0x20   :  { %762 = vmatmul.mubr.msk.f32.gmra.mxu0 %vm40_vm0, %v20_v19  ;;  %770 = vmatmul.mubr.msk.f32.gmra.mxu1 %vm40_vm0, %v28_v20 }
  0x21   :  { %189 = vmatprep.mubr.f32.mxu0 %v901_v10  ;;  %237 = vmatprep.mubr.f32.mxu1 %v901_v10 }
  0x24   :  { %763 = vmatmul.mubr.msk.f32.gmra.mxu0 %vm40_vm0, %v21_v21  ;;  %771 = vmatmul.mubr.msk.f32.gmra.mxu1 %vm40_vm0, %v29_v22 }
  0x25   :  { %195 = vmatprep.mubr.f32.mxu0 %v901_v10  ;;  %243 = vmatprep.mubr.f32.mxu1 %v901_v10 }
  0x28   :  { %764 = vmatmul.mubr.msk.f32.gmra.mxu0 %vm40_vm0, %v22_v23  ;;  %772 = vmatmul.mubr.msk.f32.gmra.mxu1 %vm40_vm0, %v30_v24  ;;  %vm739_vm0 = vcmask 1048512  }
  0xcc   :  { %v1011_v25 = vpop.f32.mrf.mxu0  ;;  %v1013_v26 = vpop.f32.mrf.mxu1 }
  0xce   :  { %v1015_v27 = vpop.f32.mrf.mxu0  ;;  %v1017_v28 = vpop.f32.mrf.mxu1 }
  0xcf   :  { %v251_v29 = vsel %vm250_vm1, %v1015_v27, -inf  ;;  %v283_v33 = vsel %vm250_vm1, %v1017_v28, -inf }
  0xd0   :  { %v1021_v30 = vpop.f32.mrf.mxu0  ;;  %v1023_v31 = vpop.f32.mrf.mxu1  ;;  %v252_v32 = vmax.f32 %v1011_v25, %v251_v29  ;;  %v284_v39 = vmax.f32 %v1013_v26, %v283_v33 }
  0xd2   :  { %v1028_v34 = vpop.f32.mrf.mxu1  ;;  %253 = vmax.xlane.f32.xlu0 %v252_v32  ;;  %v1030_v35 = vpop.f32.mrf.mxu0 }
  0xd3   :  { %v287_v36 = vsel %vm250_vm1, %v1028_v34, -inf  ;;  %v255_v41 = vsel %vm250_vm1, %v1030_v35, -inf }
  0xd4   :  { %v1034_v37 = vpop.f32.mrf.mxu0  ;;  %v288_v38 = vmax.f32 %v1023_v31, %v287_v36  ;;  %v1038_v40 = vpop.f32.mrf.mxu1  ;;  %v256_v47 = vmax.f32 %v1021_v30, %v255_v41 }
  0xd6   :  { %289 = vmax.xlane.f32.xlu1 %v288_v38  ;;  %285 = vmax.xlane.f32.xlu0 %v284_v39  ;;  %v1042_v42 = vpop.f32.mrf.mxu0  ;;  %v1044_v43 = vpop.f32.mrf.mxu1 }
  0xd7   :  { %v259_v44 = vsel %vm250_vm1, %v1042_v42, -inf  ;;  %v291_v45 = vsel %vm250_vm1, %v1044_v43, -inf }
  0xd8   :  { %v1050_v46 = vpop.f32.mrf.mxu0  ;;  %v260_v48 = vmax.f32 %v1034_v37, %v259_v44  ;;  %v1054_v49 = vpop.f32.mrf.mxu1  ;;  %v292_v52 = vmax.f32 %v1038_v40, %v291_v45 }
  0xda   :  { %257 = vmax.xlane.f32.xlu0 %v256_v47  ;;  %261 = vmax.xlane.f32.xlu1 %v260_v48  ;;  %v1056_v50 = vpop.f32.mrf.mxu0  ;;  %v1058_v51 = vpop.f32.mrf.mxu1 }
  0xdb   :  { %v263_v53 = vsel %vm250_vm1, %v1056_v50, -inf  ;;  %v295_v54 = vsel %vm250_vm1, %v1058_v51, -inf }
  0xdc   :  { %v1065_v55 = vpop.f32.mrf.mxu0  ;;  %v264_v56 = vmax.f32 %v1050_v46, %v263_v53  ;;  %v1068_v57 = vpop.f32.mrf.mxu1  ;;  %v296_v59 = vmax.f32 %v1054_v49, %v295_v54 }
  0xde   :  { %293 = vmax.xlane.f32.xlu0 %v292_v52  ;;  %265 = vmax.xlane.f32.xlu1 %v264_v56  ;;  %v1070_v58 = vpop.f32.mrf.mxu0  ;;  %v1073_v60 = vpop.f32.mrf.mxu1 }
  0xdf   :  { %v267_v61 = vsel %vm250_vm1, %v1070_v58, -inf  ;;  %v299_v9 = vsel %vm250_vm1, %v1073_v60, -inf }
  0xe0   :  { %v1077_v62 = vpop.f32.mrf.mxu0  ;;  %v268_v63 = vmax.f32 %v1065_v55, %v267_v61  ;;  %v1080_v0 = vpop.f32.mrf.mxu1  ;;  %v300_v15 = vmax.f32 %v1068_v57, %v299_v9 }
  0xe2   :  { %297 = vmax.xlane.f32.xlu1 %v296_v59  ;;  %269 = vmax.xlane.f32.xlu0 %v268_v63  ;;  %v1082_v1 = vpop.f32.mrf.mxu0  ;;  %v1084_v2 = vpop.f32.mrf.mxu1 }
  0xe3   :  { %v271_v3 = vsel %vm250_vm1, %v1082_v1, -inf  ;;  %v303_v16 = vsel %vm250_vm1, %v1084_v2, -inf }
  0xe4   :  { %v1088_v4 = vpop.f32.mrf.mxu0  ;;  %v272_v5 = vmax.f32 %v1077_v62, %v271_v3  ;;  %v1091_v6 = vpop.f32.mrf.mxu1  ;;  %v304_v22 = vmax.f32 %v1080_v0, %v303_v16 }
  0xe6   :  { %273 = vmax.xlane.f32.xlu1 %v272_v5  ;;  %v1093_v7 = vpop.f32.mrf.mxu0  ;;  %v1095_v8 = vpop.f32.mrf.mxu1 }
  0xe7   :  { %v275_v10 = vsel %vm250_vm1, %v1093_v7, -inf  ;;  %v307_v18 = vsel %vm250_vm1, %v1095_v8, -inf }
  0xe8   :  { %v1101_v11 = vpop.f32.mrf.mxu0  ;;  %v276_v12 = vmax.f32 %v1088_v4, %v275_v10  ;;  %v1104_v13 = vpop.f32.mrf.mxu1  ;;  %v308_v21 = vmax.f32 %v1091_v6, %v307_v18  ;;  %v39_v18 = vld [vmem:[%s1356_s2] sm:$0x3]  ;;  %s902_s2 = smov [#allocation2]  }
  0xe9   :  { %s749_s5 = sshll.u32 %s902_s2, 4  ;;  %s750_s5 = int_to_ptr.vmem [resolvable:$true] %s749_s5 }
  0xea   :  { %277 = vmax.xlane.f32.xlu0 %v276_v12  ;;  %v1106_v14 = vpop.f32.mrf.mxu0  ;;  %v1116_v20 = vpop.f32.mrf.mxu1  ;;  %s879_s6 = scalar_lea.vmem %s750_s5, 16  ;;  %s883_s7 = scalar_lea.vmem %s750_s5, 32 }
  0xeb   :  { %v279_v17 = vsel %vm250_vm1, %v1106_v14, -inf  ;;  %v311_v23 = vsel %vm250_vm1, %v1116_v20, -inf  ;;  %p880_p0 = scmp.ne.s32.totalorder %s750_s5, %s879_s6  ;;  %p884_p1 = scmp.lt.s32.totalorder %s750_s5, %s750_s5 }
  0xec   :  { %v280_v19 = vmax.f32 %v1101_v11, %v279_v17  ;;  %v312_v24 = vmax.f32 %v1104_v13, %v311_v23  ;;  %p885_p2 = scmp.lt.s32.totalorder %s883_s7, %s879_s6 }
  0xee   :  { %301 = vmax.xlane.f32.xlu0 %v300_v15  ;;  %281 = vmax.xlane.f32.xlu1 %v280_v19  ;;  %p886_p3 = por %p885_p2, %p884_p1 }
  0xf0   :  { %p887_p4 = pnand %p886_p3, %p880_p0 }
  0xf2   :  { %309 = vmax.xlane.f32.xlu0 %v308_v21  ;;  %305 = vmax.xlane.f32.xlu1 %v304_v22 }
  0xf6   :  { %313 = vmax.xlane.f32.xlu1 %v312_v24 }
 0x15b   :  { %v254_v29 = vpop.xlane.xlu0 %253 }
 0x15c   :  { %v315_v32 = vsub.f32 %v1011_v25, %v254_v29  ;;  %v316_v33 = vsub.f32 %v1015_v27, %v254_v29  ;;  %v476_v25 = vlaneseq }
 0x15e   :  { %v347_v36 = vmul.f32 1.442695, %v315_v32  ;;  %v349_v38 = vmul.f32 1.442695, %v316_v33  ;;  %v1134_v10 = vshrl.u32 %v476_v25, 7 }
 0x15f   :  { %v290_v39 = vpop.xlane.xlu1 %289  ;;  %v286_v41 = vpop.xlane.xlu0 %285 }
 0x160   :  { %783 = vpow2.f32 %v347_v36  ;;  %v334_v44 = vsub.f32 %v1028_v34, %v290_v39  ;;  %v331_v45 = vsub.f32 %v1013_v26, %v286_v41  ;;  %v332_v47 = vsub.f32 %v1017_v28, %v286_v41 }
 0x161   :  { %785 = vpow2.f32 %v349_v38  ;;  %v333_v27 = vsub.f32 %v1023_v31, %v290_v39  ;;  %v482_v16 = vsub.s32 1, %v1134_v10  ;;  %v478_v23 = vsub.s32 0, %v1134_v10 }
 0x162   :  { %v385_v48 = vmul.f32 1.442695, %v334_v44  ;;  %v379_v52 = vmul.f32 1.442695, %v331_v45  ;;  %v381_v53 = vmul.f32 1.442695, %v332_v47 }
 0x163   :  { %v258_v54 = vpop.xlane.xlu0 %257  ;;  %v262_v56 = vpop.xlane.xlu1 %261  ;;  %v383_v31 = vmul.f32 1.442695, %v333_v27  ;;  %v1148_v32 = vrot.slane %v39_v18, %v482_v16  ;;  %v1154_v44 = vrot.slane %v39_v18, %v478_v23 }
 0x164   :  { %v317_v59 = vsub.f32 %v1021_v30, %v258_v54  ;;  %v318_v61 = vsub.f32 %v1030_v35, %v258_v54  ;;  %787 = vpow2.f32 %v385_v48  ;;  %v320_v34 = vsub.f32 %v1042_v42, %v262_v56 }
 0x165   :  { %789 = vpow2.f32 %v379_v52  ;;  %v319_v28 = vsub.f32 %v1034_v37, %v262_v56 }
 0x166   :  { %v351_v26 = vmul.f32 1.442695, %v317_v59  ;;  %v353_v63 = vmul.f32 1.442695, %v318_v61  ;;  %791 = vpow2.f32 %v381_v53  ;;  %v357_v3 = vmul.f32 1.442695, %v320_v34 }
 0x167   :  { %v294_v5 = vpop.xlane.xlu0 %293  ;;  %v266_v9 = vpop.xlane.xlu1 %265  ;;  %v355_v42 = vmul.f32 1.442695, %v319_v28 }
 0x168   :  { %793 = vpow2.f32 %v351_v26  ;;  %v336_v30 = vsub.f32 %v1044_v43, %v294_v5  ;;  %v335_v35 = vsub.f32 %v1038_v40, %v294_v5  ;;  %v322_v12 = vsub.f32 %v1056_v50, %v266_v9 }
 0x169   :  { %795 = vpow2.f32 %v353_v63  ;;  %v321_v43 = vsub.f32 %v1050_v46, %v266_v9 }
 0x16a   :  { %797 = vpow2.f32 %v357_v3  ;;  %v389_v15 = vmul.f32 1.442695, %v336_v30  ;;  %v387_v21 = vmul.f32 1.442695, %v335_v35  ;;  %v361_v40 = vmul.f32 1.442695, %v322_v12 }
 0x16b   :  { %v298_v37 = vpop.xlane.xlu1 %297  ;;  %799 = vpow2.f32 %v383_v31  ;;  %v270_v17 = vpop.xlane.xlu0 %269  ;;  %v359_v38 = vmul.f32 1.442695, %v321_v43 }
 0x16c   :  { %801 = vpow2.f32 %v355_v42  ;;  %v338_v50 = vsub.f32 %v1058_v51, %v298_v37  ;;  %v324_v24 = vsub.f32 %v1070_v58, %v270_v17  ;;  %v337_v33 = vsub.f32 %v1054_v49, %v298_v37 }
 0x16d   :  { %v784_v19 = vpop.eup %783  ;;  %803 = vpow2.f32 %v389_v15  ;;  %v323_v46 = vsub.f32 %v1065_v55, %v270_v17 }
 0x16e   :  { %v786_v22 = vpop.eup %785  ;;  %805 = vpow2.f32 %v387_v21  ;;  %v393_v51 = vmul.f32 1.442695, %v338_v50  ;;  %v365_v45 = vmul.f32 1.442695, %v324_v24  ;;  %v391_v52 = vmul.f32 1.442695, %v337_v33 }
 0x16f   :  { %v411_v29 = vsel %vm250_vm1, %v786_v22, 0.0  ;;  %807 = vpow2.f32 %v361_v40  ;;  %v274_v41 = vpop.xlane.xlu1 %273  ;;  %v487_v48 = vmul.f32 %v786_v22, %v1148_v32  ;;  %v363_v55 = vmul.f32 1.442695, %v323_v46 }
 0x170   :  { %v412_v36 = vadd.f32 %v784_v19, %v411_v29  ;;  %809 = vpow2.f32 %v359_v38  ;;  %v326_v54 = vsub.f32 %v1082_v1, %v274_v41  ;;  %v486_v61 = vmul.f32 %v784_v19, %v1154_v44 }
 0x171   :  { %v1152_v39 = vpop.eup %787  ;;  %811 = vpow2.f32 %v393_v51  ;;  %v325_v34 = vsub.f32 %v1077_v62, %v274_v41  ;;  %v518_v28 = vsel %vm250_vm1, %v487_v48, 0.0 }
 0x172   :  { %413 = vadd.xlane.f32.xlu0 %v412_v36  ;;  %v1156_v58 = vpop.eup %789  ;;  %813 = vpow2.f32 %v365_v45  ;;  %v369_v62 = vmul.f32 1.442695, %v326_v54  ;;  %v447_v42 = vsel %vm250_vm1, %v1152_v39, 0.0  ;;  %v519_v37 = vadd.f32 %v518_v28, %v486_v61 }
 0x173   :  { %v278_v47 = vpop.xlane.xlu0 %277  ;;  %v1159_v49 = vpop.eup %791  ;;  %815 = vpow2.f32 %v391_v52 }
 0x174   :  { %v443_v56 = vsel %vm250_vm1, %v1159_v49, 0.0  ;;  %v328_v5 = vsub.f32 %v1093_v7, %v278_v47  ;;  %817 = vpow2.f32 %v363_v55  ;;  %v367_v7 = vmul.f32 1.442695, %v325_v34 }
 0x175   :  { %v794_v53 = vpop.eup %793  ;;  %v444_v59 = vadd.f32 %v1156_v58, %v443_v56  ;;  %v327_v19 = vsub.f32 %v1088_v4, %v278_v47 }
 0x176   :  { %v796_v27 = vpop.eup %795  ;;  %v373_v21 = vmul.f32 1.442695, %v328_v5  ;;  %v488_v50 = vmul.f32 %v794_v53, %v1154_v44 }
 0x177   :  { %v302_v26 = vpop.xlane.xlu0 %301  ;;  %v1167_v63 = vpop.xlane.xlu1 %281  ;;  %v415_v3 = vsel %vm250_vm1, %v796_v27, 0.0  ;;  %445 = vadd.xlane.f32.xlu0 %v444_v59  ;;  %v489_v16 = vmul.f32 %v796_v27, %v1148_v32 }
 0x178   :  { %v798_v1 = vpop.eup %797  ;;  %v339_v9 = vsub.f32 %v1068_v57, %v302_v26  ;;  %v340_v31 = vsub.f32 %v1073_v60, %v302_v26  ;;  %v416_v35 = vadd.f32 %v794_v53, %v415_v3  ;;  %v330_v45 = vsub.f32 %v1106_v14, %v1167_v63 }
 0x179   :  { %v1174_v30 = vpop.eup %799  ;;  %v419_v57 = vsel %vm250_vm1, %v798_v1, 0.0  ;;  %v522_v29 = vsel %vm250_vm1, %v489_v16, 0.0  ;;  %v491_v38 = vmul.f32 %v798_v1, %v1148_v32  ;;  %v329_v14 = vsub.f32 %v1101_v11, %v1167_v63 }
 0x17a   :  { %v395_v12 = vmul.f32 1.442695, %v339_v9  ;;  %v397_v15 = vmul.f32 1.442695, %v340_v31  ;;  %v802_v17 = vpop.eup %801  ;;  %417 = vadd.xlane.f32.xlu1 %v416_v35  ;;  %v448_v43 = vadd.f32 %v1174_v30, %v447_v42  ;;  %v523_v51 = vadd.f32 %v522_v29, %v488_v50 }
 0x17b   :  { %v306_v18 = vpop.xlane.xlu1 %305  ;;  %v1180_v60 = vpop.eup %803  ;;  %520 = vadd.xlane.f32.xlu0 %v519_v37  ;;  %v420_v24 = vadd.f32 %v802_v17, %v419_v57  ;;  %v490_v48 = vmul.f32 %v802_v17, %v1154_v44  ;;  %v526_v54 = vsel %vm250_vm1, %v491_v38, 0.0  ;;  %v377_v26 = vmul.f32 1.442695, %v330_v45 }
 0x17c   :  { %819 = vpow2.f32 %v395_v12  ;;  %v341_v22 = vsub.f32 %v1080_v0, %v306_v18  ;;  %v342_v40 = vsub.f32 %v1084_v2, %v306_v18  ;;  %v1187_v23 = vpop.eup %805  ;;  %v451_v36 = vsel %vm250_vm1, %v1180_v60, 0.0  ;;  %v310_v46 = vpop.xlane.xlu0 %309 }
 0x17d   :  { %821 = vpow2.f32 %v397_v15  ;;  %v808_v33 = vpop.eup %807  ;;  %v371_v0 = vmul.f32 1.442695, %v327_v19  ;;  %v452_v47 = vadd.f32 %v1187_v23, %v451_v36  ;;  %v344_v55 = vsub.f32 %v1095_v8, %v310_v46 }
 0x17e   :  { %823 = vpow2.f32 %v369_v62  ;;  %v401_v4 = vmul.f32 1.442695, %v342_v40  ;;  %449 = vadd.xlane.f32.xlu1 %v448_v43  ;;  %v399_v2 = vmul.f32 1.442695, %v341_v22  ;;  %v810_v41 = vpop.eup %809  ;;  %v423_v52 = vsel %vm250_vm1, %v808_v33, 0.0 }
 0x17f   :  { %825 = vpow2.f32 %v367_v7  ;;  %421 = vadd.xlane.f32.xlu0 %v420_v24  ;;  %v1198_v53 = vpop.eup %811  ;;  %v343_v59 = vsub.f32 %v1091_v6, %v310_v46  ;;  %v424_v61 = vadd.f32 %v810_v41, %v423_v52  ;;  %v527_v28 = vadd.f32 %v526_v54, %v490_v48  ;;  %v314_v5 = vpop.xlane.xlu1 %313 }
 0x180   :  { %827 = vpow2.f32 %v373_v21  ;;  %v814_v56 = vpop.eup %813  ;;  %v455_v8 = vsel %vm250_vm1, %v1198_v53, 0.0  ;;  %v493_v3 = vmul.f32 %v808_v33, %v1148_v32  ;;  %v405_v1 = vmul.f32 1.442695, %v344_v55 }
 0x181   :  { %829 = vpow2.f32 %v401_v4  ;;  %v1202_v27 = vpop.eup %815  ;;  %v427_v9 = vsel %vm250_vm1, %v814_v56, 0.0  ;;  %v375_v11 = vmul.f32 1.442695, %v329_v14  ;;  %v403_v6 = vmul.f32 1.442695, %v343_v59 }
 0x182   :  { %524 = vadd.xlane.f32.xlu1 %v523_v51  ;;  %831 = vpow2.f32 %v371_v0  ;;  %v818_v34 = vpop.eup %817  ;;  %v456_v63 = vadd.f32 %v1202_v27, %v455_v8  ;;  %v492_v62 = vmul.f32 %v810_v41, %v1154_v44  ;;  %v346_v42 = vsub.f32 %v1116_v20, %v314_v5 }
 0x183   :  { %453 = vadd.xlane.f32.xlu0 %v452_v47  ;;  %833 = vpow2.f32 %v399_v2  ;;  %v428_v12 = vadd.f32 %v818_v34, %v427_v9  ;;  %v530_v15 = vsel %vm250_vm1, %v493_v3, 0.0  ;;  %v495_v17 = vmul.f32 %v814_v56, %v1148_v32 }
 0x184   :  { %835 = vpow2.f32 %v377_v26  ;;  %v345_v57 = vsub.f32 %v1104_v13, %v314_v5  ;;  %v531_v19 = vadd.f32 %v530_v15, %v492_v62  ;;  %v409_v21 = vmul.f32 1.442695, %v346_v42 }
 0x185   :  { %837 = vpow2.f32 %v405_v1  ;;  %v494_v43 = vmul.f32 %v818_v34, %v1154_v44  ;;  %v534_v40 = vsel %vm250_vm1, %v495_v17, 0.0  ;;  %v503_v46 = vmul.f32 %v1159_v49, %v1148_v32 }
 0x186   :  { %425 = vadd.xlane.f32.xlu1 %v424_v61  ;;  %839 = vpow2.f32 %v375_v11  ;;  %v407_v29 = vmul.f32 1.442695, %v345_v57  ;;  %v502_v45 = vmul.f32 %v1156_v58, %v1154_v44  ;;  %v505_v59 = vmul.f32 %v1152_v39, %v1148_v32 }
 0x187   :  { %528 = vadd.xlane.f32.xlu0 %v527_v28  ;;  %841 = vpow2.f32 %v403_v6  ;;  %v535_v13 = vadd.f32 %v534_v40, %v494_v43  ;;  %v550_v52 = vsel %vm250_vm1, %v503_v46, 0.0  ;;  %v504_v28 = vmul.f32 %v1174_v30, %v1154_v44 }
 0x188   :  { %843 = vpow2.f32 %v409_v21  ;;  %v551_v56 = vadd.f32 %v550_v52, %v502_v45  ;;  %v554_v1 = vsel %vm250_vm1, %v505_v59, 0.0  ;;  %v507_v9 = vmul.f32 %v1180_v60, %v1148_v32 }
 0x189   :  { %v1211_v31 = vpop.eup %819  ;;  %845 = vpow2.f32 %v407_v29  ;;  %v555_v11 = vadd.f32 %v554_v1, %v504_v28  ;;  %v506_v62 = vmul.f32 %v1187_v23, %v1154_v44  ;;  %v509_v42 = vmul.f32 %v1198_v53, %v1148_v32 }
 0x18a   :  { %v1215_v35 = vpop.eup %821  ;;  %457 = vadd.xlane.f32.xlu1 %v456_v63  ;;  %v510_v23 = vmul.f32 %v1211_v31, %v1154_v44 }
 0x18b   :  { %v824_v37 = vpop.eup %823  ;;  %v459_v16 = vsel %vm250_vm1, %v1215_v35, 0.0  ;;  %429 = vadd.xlane.f32.xlu0 %v428_v12  ;;  %v558_v12 = vsel %vm250_vm1, %v507_v9, 0.0  ;;  %v511_v15 = vmul.f32 %v1215_v35, %v1148_v32  ;;  %v562_v17 = vsel %vm250_vm1, %v509_v42, 0.0 }
 0x18c   :  { %v460_v7 = vadd.f32 %v1211_v31, %v459_v16  ;;  %v826_v18 = vpop.eup %825  ;;  %v431_v22 = vsel %vm250_vm1, %v824_v37, 0.0  ;;  %v497_v38 = vmul.f32 %v824_v37, %v1148_v32  ;;  %v508_v37 = vmul.f32 %v1202_v27, %v1154_v44 }
 0x18d   :  { %v828_v20 = vpop.eup %827  ;;  %v432_v33 = vadd.f32 %v826_v18, %v431_v22  ;;  %v496_v51 = vmul.f32 %v826_v18, %v1154_v44  ;;  %v559_v16 = vadd.f32 %v558_v12, %v506_v62  ;;  %v566_v53 = vsel %vm250_vm1, %v511_v15, 0.0 }
 0x18e   :  { %532 = vadd.xlane.f32.xlu1 %v531_v19  ;;  %v1227_v50 = vpop.eup %829  ;;  %v435_v0 = vsel %vm250_vm1, %v828_v20, 0.0  ;;  %v538_v47 = vsel %vm250_vm1, %v497_v38, 0.0  ;;  %v499_v34 = vmul.f32 %v828_v20, %v1148_v32  ;;  %v563_v35 = vadd.f32 %v562_v17, %v508_v37 }
 0x18f   :  { %461 = vadd.xlane.f32.xlu0 %v460_v7  ;;  %v832_v24 = vpop.eup %831  ;;  %v463_v36 = vsel %vm250_vm1, %v1227_v50, 0.0  ;;  %v539_v54 = vadd.f32 %v538_v47, %v496_v51  ;;  %v567_v19 = vadd.f32 %v566_v53, %v510_v23  ;;  %v513_v31 = vmul.f32 %v1227_v50, %v1148_v32 }
 0x190   :  { %v1229_v4 = vpop.eup %833  ;;  %v436_v41 = vadd.f32 %v832_v24, %v435_v0  ;;  %v498_v3 = vmul.f32 %v832_v24, %v1154_v44  ;;  %v542_v39 = vsel %vm250_vm1, %v499_v34, 0.0 }
 0x191   :  { %v464_v2 = vadd.f32 %v1229_v4, %v463_v36  ;;  %v836_v48 = vpop.eup %835  ;;  %v512_v22 = vmul.f32 %v1229_v4, %v1154_v44  ;;  %v570_v24 = vsel %vm250_vm1, %v513_v31, 0.0 }
 0x192   :  { %433 = vadd.xlane.f32.xlu1 %v432_v33  ;;  %v838_v55 = vpop.eup %837  ;;  %v439_v14 = vsel %vm250_vm1, %v836_v48, 0.0  ;;  %v543_v63 = vadd.f32 %v542_v39, %v498_v3  ;;  %v501_v7 = vmul.f32 %v836_v48, %v1148_v32 }
 0x193   :  { %536 = vadd.xlane.f32.xlu0 %v535_v13  ;;  %v840_v49 = vpop.eup %839  ;;  %v467_v58 = vsel %vm250_vm1, %v838_v55, 0.0  ;;  %v515_v18 = vmul.f32 %v838_v55, %v1148_v32  ;;  %v571_v33 = vadd.f32 %v570_v24, %v512_v22 }
 0x194   :  { %v842_v61 = vpop.eup %841  ;;  %v440_v26 = vadd.f32 %v840_v49, %v439_v14  ;;  %v500_v57 = vmul.f32 %v840_v49, %v1154_v44  ;;  %v546_v20 = vsel %vm250_vm1, %v501_v7, 0.0 }
 0x195   :  { %v468_v8 = vadd.f32 %v842_v61, %v467_v58  ;;  %v844_v5 = vpop.eup %843  ;;  %v514_v27 = vmul.f32 %v842_v61, %v1154_v44  ;;  %v574_v21 = vsel %vm250_vm1, %v515_v18, 0.0  ;;  %v1288_v58 = vand.u32 127, %v476_v25 }
 0x196   :  { %465 = vadd.xlane.f32.xlu1 %v464_v2  ;;  %v846_v6 = vpop.eup %845  ;;  %v471_v30 = vsel %vm250_vm1, %v844_v5, 0.0  ;;  %v547_v43 = vadd.f32 %v546_v20, %v500_v57  ;;  %v517_v29 = vmul.f32 %v844_v5, %v1148_v32 }
 0x197   :  { %437 = vadd.xlane.f32.xlu0 %v436_v41  ;;  %v472_v60 = vadd.f32 %v846_v6, %v471_v30  ;;  %v575_v40 = vadd.f32 %v574_v21, %v514_v27  ;;  %v516_v13 = vmul.f32 %v846_v6, %v1154_v44  ;;  %v650_v3 = vadd.s32 4294967272, %v1288_v58 }
 0x198   :  { %v578_v50 = vsel %vm250_vm1, %v517_v29, 0.0  ;;  %v657_v5 = vadd.s32 4294967264, %v1288_v58  ;;  %v664_v25 = vadd.s32 4294967256, %v1288_v58  ;;  %v634_v6 = vsub.s32 %v1288_v58, %v1134_v10 }
 0x199   :  { %v579_v36 = vadd.f32 %v578_v50, %v516_v13  ;;  %v653_v12 = vsub.s32 %v650_v3, %v1134_v10  ;;  %v671_v53 = vadd.s32 4294967248, %v1288_v58  ;;  %v692_v27 = vadd.s32 4294967224, %v1288_v58 }
 0x19a   :  { %540 = vadd.xlane.f32.xlu1 %v539_v54  ;;  %v660_v37 = vsub.s32 %v657_v5, %v1134_v10  ;;  %v667_v7 = vsub.s32 %v664_v25, %v1134_v10  ;;  %v1311_v20 = vadd.s32 4294967216, %v1288_v58  ;;  %v1317_v22 = vadd.s32 4294967208, %v1288_v58 }
 0x19b   :  { %552 = vadd.xlane.f32.xlu0 %v551_v56 }
 0x19e   :  { %441 = vadd.xlane.f32.xlu1 %v440_v26  ;;  %v636_v26 = vadd.s32 4294967288, %v1288_v58 }
 0x19f   :  { %469 = vadd.xlane.f32.xlu0 %v468_v8  ;;  %v643_v8 = vadd.s32 4294967280, %v1288_v58 }
 0x1a1   :  { %v646_v42 = vsub.s32 %v643_v8, %v1134_v10 }
 0x1a2   :  { %556 = vadd.xlane.f32.xlu1 %v555_v11 }
 0x1a3   :  { %544 = vadd.xlane.f32.xlu0 %v543_v63  ;;  %v639_v63 = vsub.s32 %v636_v26, %v1134_v10 }
 0x1a6   :  { %473 = vadd.xlane.f32.xlu1 %v472_v60 }
 0x1a7   :  { %560 = vadd.xlane.f32.xlu0 %v559_v16  ;;  %v1304_v16 = vadd.s32 4294967232, %v1288_v58 }
 0x1a9   :  { %v688_v50 = vsub.s32 %v1304_v16, %v1134_v10 }
 0x1aa   :  { %564 = vadd.xlane.f32.xlu1 %v563_v35 }
 0x1ab   :  { %568 = vadd.xlane.f32.xlu0 %v567_v19 }
 0x1ae   :  { %548 = vadd.xlane.f32.xlu1 %v547_v43  ;;  %v1314_v43 = vadd.s32 4294967200, %v1288_v58 }
 0x1af   :  { %576 = vadd.xlane.f32.xlu0 %v575_v40  ;;  %v1320_v40 = vadd.s32 4294967184, %v1288_v58 }
 0x1b2   :  { %572 = vadd.xlane.f32.xlu1 %v571_v33  ;;  %v678_v33 = vadd.s32 4294967240, %v1288_v58 }
 0x1b6   :  { %580 = vadd.xlane.f32.xlu1 %v579_v36  ;;  %v674_v36 = vsub.s32 %v671_v53, %v1134_v10 }
 0x1fb   :  { %v414_v38 = vpop.xlane.xlu0 %413 }
 0x1fc   :  { %847 = vrcp.f32 %v414_v38 }
 0x200   :  { %v446_v0 = vpop.xlane.xlu0 %445 }
 0x203   :  { %v418_v46 = vpop.xlane.xlu1 %417 }
 0x204   :  { %v1283_v2 = vpop.xlane.xlu0 %520  ;;  %849 = vrcp.f32 %v418_v46 }
 0x207   :  { %v450_v4 = vpop.xlane.xlu1 %449 }
 0x208   :  { %v422_v51 = vpop.xlane.xlu0 %421 }
 0x209   :  { %851 = vrcp.f32 %v422_v51  ;;  %v848_v1 = vpop.eup %847 }
 0x20a   :  { %v598_v57 = vmul.f32 %v848_v1, %v1283_v2 }
 0x20b   :  { %v525_v41 = vpop.xlane.xlu1 %524 }
 0x20c   :  { %v454_v45 = vpop.xlane.xlu0 %453  ;;  %v635_v46 = vrot.slane %v598_v57, %v634_v6 }
 0x20f   :  { %v426_v32 = vpop.xlane.xlu1 %425 }
 0x210   :  { %v529_v47 = vpop.xlane.xlu0 %528  ;;  %853 = vrcp.f32 %v426_v32  ;;  %v702_v32 = vsub.s32 %v1311_v20, %v1134_v10 }
 0x211   :  { %v850_v39 = vpop.eup %849 }
 0x212   :  { %v599_v60 = vmul.f32 %v850_v39, %v525_v41 }
 0x213   :  { %v458_v48 = vpop.xlane.xlu1 %457 }
 0x214   :  { %v430_v52 = vpop.xlane.xlu0 %429  ;;  %v640_v24 = vrot.slane %v599_v60, %v639_v63 }
 0x215   :  { %855 = vrcp.f32 %v430_v52 }
 0x216   :  { %v852_v11 = vpop.eup %851 }
 0x217   :  { %v533_v55 = vpop.xlane.xlu1 %532  ;;  %v600_v17 = vmul.f32 %v852_v11, %v529_v47  ;;  %v716_v47 = vsub.s32 %v1314_v43, %v1134_v10 }
 0x218   :  { %v462_v44 = vpop.xlane.xlu0 %461 }
 0x219   :  { %v647_v13 = vrot.slane %v600_v17, %v646_v42  ;;  %v734_v42 = vadd.s32 4294967176, %v1288_v58 }
 0x21b   :  { %v434_v54 = vpop.xlane.xlu1 %433 }
 0x21c   :  { %v537_v49 = vpop.xlane.xlu0 %536  ;;  %857 = vrcp.f32 %v434_v54  ;;  %v730_v54 = vsub.s32 %v1320_v40, %v1134_v10 }
 0x21d   :  { %v854_v30 = vpop.eup %853 }
 0x21e   :  { %v601_v19 = vmul.f32 %v854_v30, %v533_v55  ;;  %v642_v55 = vsel %vm641_vm2, %v640_v24, %v635_v46 }
 0x21f   :  { %v466_v56 = vpop.xlane.xlu1 %465 }
 0x220   :  { %v438_v14 = vpop.xlane.xlu0 %437  ;;  %v654_v2 = vrot.slane %v601_v19, %v653_v12 }
 0x221   :  { %859 = vrcp.f32 %v438_v14  ;;  %v649_v14 = vsel %vm648_vm3, %v647_v13, %v642_v55 }
 0x222   :  { %861 = vrcp.f32 %v446_v0  ;;  %v856_v15 = vpop.eup %855  ;;  %v656_v3 = vsel %vm655_vm4, %v654_v2, %v649_v14 }
 0x223   :  { %v541_v59 = vpop.xlane.xlu1 %540  ;;  %863 = vrcp.f32 %v450_v4  ;;  %v602_v21 = vmul.f32 %v856_v15, %v537_v49  ;;  %v695_v4 = vsub.s32 %v692_v27, %v1134_v10  ;;  %v681_v49 = vsub.s32 %v678_v33, %v1134_v10 }
 0x224   :  { %v1285_v61 = vpop.xlane.xlu0 %552  ;;  %v737_v27 = vsub.s32 %v734_v42, %v1134_v10 }
 0x227   :  { %v442_v34 = vpop.xlane.xlu1 %441 }
 0x228   :  { %v470_v28 = vpop.xlane.xlu0 %469  ;;  %865 = vrcp.f32 %v442_v34 }
 0x229   :  { %867 = vrcp.f32 %v454_v45  ;;  %v858_v23 = vpop.eup %857  ;;  %v661_v45 = vrot.slane %v602_v21, %v660_v37 }
 0x22a   :  { %869 = vrcp.f32 %v458_v48  ;;  %v603_v29 = vmul.f32 %v858_v23, %v541_v59  ;;  %v709_v48 = vsub.s32 %v1317_v22, %v1134_v10 }
 0x22b   :  { %v1295_v9 = vpop.xlane.xlu1 %556  ;;  %871 = vrcp.f32 %v462_v44  ;;  %v663_v25 = vsel %vm662_vm5, %v661_v45, %v656_v3 }
 0x22c   :  { %v545_v62 = vpop.xlane.xlu0 %544  ;;  %873 = vrcp.f32 %v466_v56  ;;  %v668_v44 = vrot.slane %v603_v29, %v667_v7 }
 0x22d   :  { %875 = vrcp.f32 %v470_v28  ;;  %v720_v28 = vadd.s32 4294967192, %v1288_v58 }
 0x22e   :  { %v860_v35 = vpop.eup %859 }
 0x22f   :  { %v474_v18 = vpop.xlane.xlu1 %473  ;;  %v604_v38 = vmul.f32 %v860_v35, %v545_v62  ;;  %v862_v41 = vpop.eup %861  ;;  %v723_v37 = vsub.s32 %v720_v28, %v1134_v10 }
 0x230   :  { %v561_v31 = vpop.xlane.xlu0 %560  ;;  %877 = vrcp.f32 %v474_v18  ;;  %v864_v52 = vpop.eup %863  ;;  %v606_v59 = vmul.f32 %v862_v41, %v1285_v61  ;;  %v670_v61 = vsel %vm669_vm6, %v668_v44, %v663_v25 }
 0x231   :  { %v675_v34 = vrot.slane %v604_v38, %v674_v36  ;;  %v607_v1 = vmul.f32 %v864_v52, %v1295_v9 }
 0x232   :  { %v689_v15 = vrot.slane %v606_v59, %v688_v50 }
 0x233   :  { %v565_v0 = vpop.xlane.xlu1 %564  ;;  %v677_v9 = vsel %vm676_vm7, %v675_v34, %v670_v61  ;;  %v696_v17 = vrot.slane %v607_v1, %v695_v4 }
 0x234   :  { %v569_v51 = vpop.xlane.xlu0 %568 }
 0x235   :  { %v866_v56 = vpop.eup %865 }
 0x236   :  { %v868_v8 = vpop.eup %867 }
 0x237   :  { %v549_v26 = vpop.xlane.xlu1 %548  ;;  %v870_v39 = vpop.eup %869  ;;  %v608_v11 = vmul.f32 %v868_v8, %v561_v31 }
 0x238   :  { %v605_v5 = vmul.f32 %v866_v56, %v549_v26  ;;  %v872_v6 = vpop.eup %871  ;;  %v609_v63 = vmul.f32 %v870_v39, %v565_v0  ;;  %v577_v62 = vpop.xlane.xlu0 %576 }
 0x239   :  { %v874_v12 = vpop.eup %873  ;;  %v610_v60 = vmul.f32 %v872_v6, %v569_v51  ;;  %v703_v18 = vrot.slane %v608_v11, %v702_v32 }
 0x23a   :  { %v682_v30 = vrot.slane %v605_v5, %v681_v49  ;;  %v876_v23 = vpop.eup %875  ;;  %v710_v58 = vrot.slane %v609_v63, %v709_v48 }
 0x23b   :  { %v573_v16 = vpop.xlane.xlu1 %572  ;;  %v612_v35 = vmul.f32 %v876_v23, %v577_v62  ;;  %v717_v31 = vrot.slane %v610_v60, %v716_v47 }
 0x23c   :  { %v684_v7 = vsel %vm683_vm8, %v682_v30, %v677_v9  ;;  %v611_v53 = vmul.f32 %v874_v12, %v573_v16 }
 0x23d   :  { %v691_v57 = vsel %vm690_vm9, %v689_v15, %v684_v7  ;;  %v878_v20 = vpop.eup %877  ;;  %v731_v29 = vrot.slane %v612_v35, %v730_v54 }
 0x23e   :  { %v698_v19 = vsel %vm697_vm10, %v696_v17, %v691_v57  ;;  %v724_v22 = vrot.slane %v611_v53, %v723_v37 }
 0x23f   :  { %v581_v21 = vpop.xlane.xlu1 %580  ;;  %v705_v43 = vsel %vm704_vm11, %v703_v18, %v698_v19 }
 0x240   :  { %v613_v40 = vmul.f32 %v878_v20, %v581_v21  ;;  %v712_v24 = vsel %vm711_vm12, %v710_v58, %v705_v43 }
 0x241   :  { %v719_v33 = vsel %vm718_vm13, %v717_v31, %v712_v24 }
 0x242   :  { %v738_v13 = vrot.slane %v613_v40, %v737_v27  ;;  %v726_v50 = vsel %vm725_vm14, %v724_v22, %v719_v33 }
 0x243   :  { %v733_v36 = vsel %vm732_vm15, %v731_v29, %v726_v50 }
 0x244   :  { %v740_v10 = vsel %vm739_vm0, %v738_v13, %v733_v36 }
 0x245   :  { %742 = vst [vmem:[#allocation2] sm:$0x1] %v740_v10 }
 0x246   :  { %890 = shalt.err (!%p887_p4)
}
 0x247   :  { %752 = dma.vmem_to_hbm [thread:$0]  %s750_s5, 16, %s1357_s3, [#allocation3]  }
 0x248   :  { %899 = dma.done.wait [#allocation3], 16  }
 0x249   :  { %900 = vsyncadd [#allocation3], 4294967280 }
 0x24a   :  { %756 = vsyncpa [#allocation3], 1 }

</bundles_post_ra>
